<compile_context>
chip_gen: v7x
topology: tpu7x:2x2x1
jax: 0.10.0
libtpu: 0.0.40
codegen_flags: <defaults>
</compile_context>

<pallas_src>
import functools

import jax
import jax.numpy as jnp
from jax.experimental import pallas as pl
from jax.experimental.pallas import tpu as pltpu

H1 = 256    # front_layers[0]
H2 = 128    # front_layers[1]
HEAD = 64   # value_size == advantage_size


def duel_q_kernel(x_ref, w1_ref, w2_ref, wh_ref, b_ref, q_ref, *, action_size):
    bf16 = jnp.bfloat16
    x = x_ref[...]                     # (TB, S), already bf16

    b1 = b_ref[0:1, :]                 # (1, 256) front layer 1 bias
    b2 = b_ref[1:2, 0:H2]              # (1, 128) front layer 2 bias
    bh1 = b_ref[2:3, 0:H2]             # (1, 128) concat(value-head | adv-head) bias
    bq = b_ref[3:4, 0:H2]              # (1, 128) folded dueling bias (zero-padded)

    # front_seq: Linear -> ReLU -> Linear -> ReLU
    h = jnp.dot(x, w1_ref[...], preferred_element_type=jnp.float32) + b1
    h = jnp.maximum(h, 0.0)
    h = jnp.dot(h.astype(bf16), w2_ref[...],
                preferred_element_type=jnp.float32) + b2
    h = jnp.maximum(h, 0.0)

    # fused first layers of both heads: cols [0:64]=value feats, [64:128]=adv
    h3 = jnp.dot(h.astype(bf16), wh_ref[:, 0:H2],
                 preferred_element_type=jnp.float32) + bh1
    h3 = jnp.maximum(h3, 0.0)

    # fused second layers with the dueling combine folded into the weights:
    # column j (< A) of this matmul is already  V + A_j - mean_k(A_k).
    out = jnp.dot(h3.astype(bf16), wh_ref[:, H2:2 * H2],
                  preferred_element_type=jnp.float32) + bq       # (TB, 128)
    q_ref[...] = out[:, 0:action_size]


def _pick_tb(batch, block_b):
    """Batch tile: multiple of 16 (bf16 sublane packing) and, when the batch
    allows it, chosen so the grid has >= 2 steps (v7x megacore split)."""
    if batch <= 16:
        return batch                       # block equals full batch dim
    half = -(-batch // 2)                  # ceil(B / 2)
    tb = -(-half // 16) * 16               # round up to a multiple of 16
    return min(block_b, tb)


def duel_q_forward(state, packed, action_size, *, block_b=2048):
    """state: (B, state_size) float -> (B, action_size) float32."""
    w1, w2, wh, bias = packed
    B, S = state.shape
    state = state.astype(jnp.bfloat16)     # halve the streaming input bytes
    TB = _pick_tb(B, block_b)
    grid = (pl.cdiv(B, TB),)

    flops = 2 * B * (S * H1 + H1 * H2 + H2 * H2 + H2 * H2)
    bytes_accessed = (state.size * 2
                      + w1.size * 2 + w2.size * 2 + wh.size * 2
                      + bias.size * 4 + B * action_size * 4)

    kernel = functools.partial(duel_q_kernel, action_size=action_size)
    return pl.pallas_call(
        kernel,
        out_shape=jax.ShapeDtypeStruct((B, action_size), jnp.float32),
        grid=grid,
        in_specs=[
            pl.BlockSpec((TB, S), lambda i: (i, 0)),        # state: batch-tiled
            pl.BlockSpec(w1.shape, lambda i: (0, 0)),       # weights: VMEM-resident
            pl.BlockSpec(w2.shape, lambda i: (0, 0)),
            pl.BlockSpec(wh.shape, lambda i: (0, 0)),
            pl.BlockSpec(bias.shape, lambda i: (0, 0)),
        ],
        out_specs=pl.BlockSpec((TB, action_size), lambda i: (i, 0)),
        compiler_params=pltpu.CompilerParams(
            dimension_semantics=("parallel",),
            vmem_limit_bytes=32 * 1024 * 1024),
        cost_estimate=pl.CostEstimate(
            flops=flops, transcendentals=0, bytes_accessed=bytes_accessed),
    )(state, w1, w2, wh, bias)


def init_params(key, state_size, action_size):
    """nn.Linear-style init; weights stored transposed (in, out) in bf16,
    biases as (1, out) f32 rows."""
    def linear(k, fan_in, fan_out):
        kw, kb = jax.random.split(k)
        bound = 1.0 / float(fan_in) ** 0.5
        w = jax.random.uniform(kw, (fan_in, fan_out), jnp.float32,
                               -bound, bound).astype(jnp.bfloat16)
        b = jax.random.uniform(kb, (1, fan_out), jnp.float32, -bound, bound)
        return w, b

    keys = jax.random.split(key, 6)
    w1, b1 = linear(keys[0], state_size, H1)
    w2, b2 = linear(keys[1], H1, H2)
    wv1, bv1 = linear(keys[2], H2, HEAD)
    wv2, bv2 = linear(keys[3], HEAD, 1)
    wa1, ba1 = linear(keys[4], H2, HEAD)
    wa2, ba2 = linear(keys[5], HEAD, action_size)
    return dict(w1=w1, b1=b1, w2=w2, b2=b2,
                wv1=wv1, bv1=bv1, wv2=wv2, bv2=bv2,
                wa1=wa1, ba1=ba1, wa2=wa2, ba2=ba2)


def pack_params(p, action_size):
    """Pack the 12 per-layer tensors into 4 TPU-friendly operands, folding the
    dueling combine (advantage mean subtraction + value broadcast + biases)
    into the second-layer head weights/bias.  Folding is done in f32, then a
    single bf16 cast, to avoid double rounding."""
    A = action_size
    f32 = jnp.float32
    wv1 = p["wv1"].astype(f32)
    wa1 = p["wa1"].astype(f32)
    wv2 = p["wv2"].astype(f32)                                   # (HEAD, 1)
    wa2 = p["wa2"].astype(f32)                                   # (HEAD, A)

    wa2c = wa2 - wa2.mean(axis=1, keepdims=True)                 # (HEAD, A)
    bq = p["ba2"][0] - p["ba2"][0].mean() + p["bv2"][0, 0]       # (A,)

    # Fused head weight slab:
    #   cols [0:128]   = [wv1 | wa1]                 (first layers of both heads)
    #   cols [128:256] = rows 0:64  -> wv2 broadcast across the A q-columns
    #                    rows 64:128-> (wa2 - mean_k wa2); cols >= A stay zero
    wh = jnp.zeros((H2, 2 * H2), f32)
    wh = wh.at[:, 0:HEAD].set(wv1)
    wh = wh.at[:, HEAD:H2].set(wa1)
    wh = wh.at[0:HEAD, H2:H2 + A].set(jnp.broadcast_to(wv2, (HEAD, A)))
    wh = wh.at[HEAD:H2, H2:H2 + A].set(wa2c)
    wh = wh.astype(jnp.bfloat16)

    bias = jnp.zeros((4, H1), jnp.float32)
    bias = bias.at[0, :].set(p["b1"][0])
    bias = bias.at[1, 0:H2].set(p["b2"][0])
    bias = bias.at[2, 0:HEAD].set(p["bv1"][0])
    bias = bias.at[2, HEAD:H2].set(p["ba1"][0])
    bias = bias.at[3, 0:A].set(bq)
    return p["w1"], p["w2"], wh, bias


def reference_forward(state, p):
    """Pure-JAX reference mirroring the PyTorch module (bf16 weights,
    f32 accumulation, explicit dueling combine)."""
    def mm(x, w):
        return jnp.dot(x.astype(jnp.bfloat16), w,
                       preferred_element_type=jnp.float32)

    h = jnp.maximum(mm(state, p["w1"]) + p["b1"], 0.0)
    h = jnp.maximum(mm(h, p["w2"]) + p["b2"], 0.0)
    v = jnp.maximum(mm(h, p["wv1"]) + p["bv1"], 0.0)
    value = mm(v, p["wv2"]) + p["bv2"]
    a = jnp.maximum(mm(h, p["wa1"]) + p["ba1"], 0.0)
    adv = mm(a, p["wa2"]) + p["ba2"]
    return value + (adv - adv.mean(axis=1, keepdims=True))


if __name__ == "__main__":
    key = jax.random.PRNGKey(0)
    k_params, k_state = jax.random.split(key)

    state_size = 16
    action_size = 8
    batch = 8

    params = init_params(k_params, state_size, action_size)
    packed = pack_params(params, action_size)
    state = jax.random.normal(k_state, (batch, state_size), jnp.float32)

    q = duel_q_forward(state, packed, action_size)
    q = jax.block_until_ready(q)

    q_ref = reference_forward(state, params)
    assert q.shape == (batch, action_size)
    # bf16 weights + folded-combine rounding vs. the unfolded bf16 reference:
    # differences are O(1e-3); 2e-2 tolerance is comfortably safe.
    assert jnp.allclose(q, q_ref, atol=2e-2, rtol=2e-2), "mismatch vs reference"

    print("KERNEL_OK")
</pallas_src>

<mosaic_0001>
module attributes {stable_mosaic.version = 11 : i64} {
  func.func @duel_q_kernel(%arg0: i32, %arg1: memref<8x16xbf16, #tpu.memory_space<vmem>>, %arg2: memref<16x256xbf16, #tpu.memory_space<vmem>>, %arg3: memref<256x128xbf16, #tpu.memory_space<vmem>>, %arg4: memref<128x256xbf16, #tpu.memory_space<vmem>>, %arg5: memref<4x256xf32, #tpu.memory_space<vmem>>, %arg6: memref<8x8xf32, #tpu.memory_space<vmem>>) attributes {dimension_semantics = [#tpu.dimension_semantics<parallel>], iteration_bounds = array<i64: 1>, scalar_prefetch = 0 : i64, scratch_operands = 0 : i64, tpu.core_type = #tpu.core_type<tc>, window_params = [{transform_indices = @transform_0, window_bounds = array<i64: 8, 16>}, {pipeline_mode = #tpu.pipeline_mode<synchronous>, transform_indices = @transform_1, window_bounds = array<i64: 16, 256>}, {pipeline_mode = #tpu.pipeline_mode<synchronous>, transform_indices = @transform_2, window_bounds = array<i64: 256, 128>}, {pipeline_mode = #tpu.pipeline_mode<synchronous>, transform_indices = @transform_3, window_bounds = array<i64: 128, 256>}, {pipeline_mode = #tpu.pipeline_mode<synchronous>, transform_indices = @transform_4, window_bounds = array<i64: 4, 256>}, {transform_indices = @transform_5, window_bounds = array<i64: 8, 8>}]} {
    %c0 = arith.constant 0 : index
    %c0_0 = arith.constant 0 : index
    %0 = vector.load %arg1[%c0, %c0_0] : memref<8x16xbf16, #tpu.memory_space<vmem>>, vector<8x16xbf16>
    %c0_1 = arith.constant 0 : index
    %c0_2 = arith.constant 0 : index
    %1 = vector.load %arg5[%c0_1, %c0_2] : memref<4x256xf32, #tpu.memory_space<vmem>>, vector<1x256xf32>
    %c1 = arith.constant 1 : index
    %c0_3 = arith.constant 0 : index
    %2 = vector.load %arg5[%c1, %c0_3] : memref<4x256xf32, #tpu.memory_space<vmem>>, vector<1x128xf32>
    %c2 = arith.constant 2 : index
    %c0_4 = arith.constant 0 : index
    %3 = vector.load %arg5[%c2, %c0_4] : memref<4x256xf32, #tpu.memory_space<vmem>>, vector<1x128xf32>
    %c3 = arith.constant 3 : index
    %c0_5 = arith.constant 0 : index
    %4 = vector.load %arg5[%c3, %c0_5] : memref<4x256xf32, #tpu.memory_space<vmem>>, vector<1x128xf32>
    %c0_6 = arith.constant 0 : index
    %c0_7 = arith.constant 0 : index
    %5 = vector.load %arg2[%c0_6, %c0_7] : memref<16x256xbf16, #tpu.memory_space<vmem>>, vector<16x256xbf16>
    %cst = arith.constant dense<0.000000e+00> : vector<8x256xf32>
    %6 = tpu.matmul %0, %5, %cst {dimension_numbers = #tpu.dot_dimension_numbers<[1], [0], [0], [1], [0, 0, 1, 1], [], []>} : vector<8x16xbf16>, vector<16x256xbf16>, vector<8x256xf32> -> vector<8x256xf32>
    %7 = vector.broadcast %1 : vector<1x256xf32> to vector<8x256xf32>
    %8 = arith.addf %6, %7 : vector<8x256xf32>
    %cst_8 = arith.constant 0.000000e+00 : f32
    %9 = vector.broadcast %cst_8 : f32 to vector<8x256xf32>
    %10 = arith.maximumf %8, %9 : vector<8x256xf32>
    %11 = arith.truncf %10 : vector<8x256xf32> to vector<8x256xbf16>
    %c0_9 = arith.constant 0 : index
    %c0_10 = arith.constant 0 : index
    %12 = vector.load %arg3[%c0_9, %c0_10] : memref<256x128xbf16, #tpu.memory_space<vmem>>, vector<256x128xbf16>
    %cst_11 = arith.constant dense<0.000000e+00> : vector<8x128xf32>
    %13 = tpu.matmul %11, %12, %cst_11 {dimension_numbers = #tpu.dot_dimension_numbers<[1], [0], [0], [1], [0, 0, 1, 1], [], []>} : vector<8x256xbf16>, vector<256x128xbf16>, vector<8x128xf32> -> vector<8x128xf32>
    %14 = vector.broadcast %2 : vector<1x128xf32> to vector<8x128xf32>
    %15 = arith.addf %13, %14 : vector<8x128xf32>
    %cst_12 = arith.constant 0.000000e+00 : f32
    %16 = vector.broadcast %cst_12 : f32 to vector<8x128xf32>
    %17 = arith.maximumf %15, %16 : vector<8x128xf32>
    %18 = arith.truncf %17 : vector<8x128xf32> to vector<8x128xbf16>
    %c0_13 = arith.constant 0 : index
    %c0_14 = arith.constant 0 : index
    %19 = vector.load %arg4[%c0_13, %c0_14] : memref<128x256xbf16, #tpu.memory_space<vmem>>, vector<128x128xbf16>
    %cst_15 = arith.constant dense<0.000000e+00> : vector<8x128xf32>
    %20 = tpu.matmul %18, %19, %cst_15 {dimension_numbers = #tpu.dot_dimension_numbers<[1], [0], [0], [1], [0, 0, 1, 1], [], []>} : vector<8x128xbf16>, vector<128x128xbf16>, vector<8x128xf32> -> vector<8x128xf32>
    %21 = vector.broadcast %3 : vector<1x128xf32> to vector<8x128xf32>
    %22 = arith.addf %20, %21 : vector<8x128xf32>
    %cst_16 = arith.constant 0.000000e+00 : f32
    %23 = vector.broadcast %cst_16 : f32 to vector<8x128xf32>
    %24 = arith.maximumf %22, %23 : vector<8x128xf32>
    %25 = arith.truncf %24 : vector<8x128xf32> to vector<8x128xbf16>
    %c0_17 = arith.constant 0 : index
    %c128 = arith.constant 128 : index
    %26 = vector.load %arg4[%c0_17, %c128] : memref<128x256xbf16, #tpu.memory_space<vmem>>, vector<128x128xbf16>
    %cst_18 = arith.constant dense<0.000000e+00> : vector<8x128xf32>
    %27 = tpu.matmul %25, %26, %cst_18 {dimension_numbers = #tpu.dot_dimension_numbers<[1], [0], [0], [1], [0, 0, 1, 1], [], []>} : vector<8x128xbf16>, vector<128x128xbf16>, vector<8x128xf32> -> vector<8x128xf32>
    %28 = vector.broadcast %4 : vector<1x128xf32> to vector<8x128xf32>
    %29 = arith.addf %27, %28 : vector<8x128xf32>
    %30 = vector.extract_strided_slice %29 {offsets = [0, 0], sizes = [8, 8], strides = [1, 1]} : vector<8x128xf32> to vector<8x8xf32>
    %c0_19 = arith.constant 0 : index
    %c0_20 = arith.constant 0 : index
    %31 = vector.load %arg6[%c0_19, %c0_20] : memref<8x8xf32, #tpu.memory_space<vmem>>, vector<8x8xf32>
    tpu.vector_store %arg6[%c0_19, %c0_20], %30 {strides = array<i32>} : memref<8x8xf32, #tpu.memory_space<vmem>>, vector<8x8xf32>,
    return
  }
  func.func @transform_0(%arg0: i32) -> (i32, i32) {
    %c0_i32 = arith.constant 0 : i32
    %c0_i32_0 = arith.constant 0 : i32
    return %arg0, %c0_i32 : i32, i32
  }
  func.func @transform_1(%arg0: i32) -> (i32, i32) {
    %c0_i32 = arith.constant 0 : i32
    %c0_i32_0 = arith.constant 0 : i32
    %c0_i32_1 = arith.constant 0 : i32
    return %c0_i32, %c0_i32_0 : i32, i32
  }
  func.func @transform_2(%arg0: i32) -> (i32, i32) {
    %c0_i32 = arith.constant 0 : i32
    %c0_i32_0 = arith.constant 0 : i32
    %c0_i32_1 = arith.constant 0 : i32
    return %c0_i32, %c0_i32_0 : i32, i32
  }
  func.func @transform_3(%arg0: i32) -> (i32, i32) {
    %c0_i32 = arith.constant 0 : i32
    %c0_i32_0 = arith.constant 0 : i32
    %c0_i32_1 = arith.constant 0 : i32
    return %c0_i32, %c0_i32_0 : i32, i32
  }
  func.func @transform_4(%arg0: i32) -> (i32, i32) {
    %c0_i32 = arith.constant 0 : i32
    %c0_i32_0 = arith.constant 0 : i32
    %c0_i32_1 = arith.constant 0 : i32
    return %c0_i32, %c0_i32_0 : i32, i32
  }
  func.func @transform_5(%arg0: i32) -> (i32, i32) {
    %c0_i32 = arith.constant 0 : i32
    %c0_i32_0 = arith.constant 0 : i32
    return %arg0, %c0_i32 : i32, i32
  }
}

</mosaic_0001>

<bundles_post_ra>
// kernel: tpu_custom_call.1
= control target key start
LH: loop header
LB: loop body
LE: loop exit
PB: predicated region body
PF: predicated region fallthrough
CT: control target
= control target key end

     0   :  { %10 = vsyncpa [#allocation3], 0  ;;  %s984_s0 = inlined_call_operand.hbm [shape: bf16[8,16], index: 0, kind: input, shape index: {}]   ;;  %s985_s1 = inlined_call_operand.hbm [shape: bf16[16,256], index: 1, kind: input, shape index: {}]   ;;  %s986_s2 = inlined_call_operand.hbm [shape: bf16[256,128], index: 2, kind: input, shape index: {}]   ;;  %s987_s3 = inlined_call_operand.hbm [shape: bf16[128,256], index: 3, kind: input, shape index: {}]   ;;  %s988_s4 = inlined_call_operand.vmem [shape: f32[4,256], index: 4, kind: input, shape index: {}]   ;;  %s989_s5 = inlined_call_operand.hbm [shape: f32[8,8], index: 5, kind: output, shape index: {}]  }
   0x1   :  { %11 = vsyncpa [#allocation6], 0 }
   0x2   :  { %12 = vsyncpa [#allocation9], 0 }
   0x3   :  { %13 = vsyncpa [#allocation4], 0  ;;  %s846_s18 = smov [#allocation5]   ;;  %s728_s22 = scalar_lea.hbm %s985_s1, 256 }
   0x4   :  { %s29_s19 = sshll.u32 %s846_s18, 4  ;;  %p729_p0 = scmp.ne.s32.totalorder %s985_s1, %s728_s22  ;;  %s30_s19 = int_to_ptr.vmem [resolvable:$true] %s29_s19 }
   0x5   :  { %p732_p1 = scmp.lt.u32.totalorder %s728_s22, %s985_s1 }
   0x7   :  { %p734_p2 = pnand %p732_p1, %p729_p0 }
   0x9   :  { %737 = shalt.err (!%p734_p2)
}
   0xa   :  { %s738_s27 = scalar_lea.vmem %s30_s19, 256  ;;  %p743_p4 = scmp.lt.s32.totalorder %s30_s19, %s30_s19 }
   0xb   :  { %p739_p3 = scmp.ne.s32.totalorder %s30_s19, %s738_s27  ;;  %p744_p5 = scmp.lt.s32.totalorder %s738_s27, %s738_s27 }
   0xd   :  { %p745_p6 = por %p744_p5, %p743_p4 }
   0xf   :  { %p746_p7 = pnand %p745_p6, %p739_p3 }
  0x11   :  { %749 = shalt.err (!%p746_p7)
}
  0x12   :  { %s847_s28 = smov 128   ;;  %s848_s29 = smov 8  }
  0x13   :  { %35 = dma.hbm_to_vmem [thread:$0]  %s985_s1, 256, %s30_s19, [#allocation6], %s847_s28, %s847_s28, %s848_s29  }
  0x14   :  { %s849_s7 = smov [#allocation2]   ;;  %s850_s9 = smov [#allocation7]  }
  0x15   :  { %s20_s8 = sshll.u32 %s849_s7, 4  ;;  %s41_s10 = sshll.u32 %s850_s9, 4  ;;  %s21_s8 = int_to_ptr.vmem [resolvable:$true] %s20_s8  ;;  %s42_s10 = int_to_ptr.vmem [resolvable:$true] %s41_s10 }
  0x16   :  { %s750_s13 = scalar_lea.hbm %s984_s0, 64 }
  0x17   :  { %p751_p8 = scmp.ne.s32.totalorder %s984_s0, %s750_s13  ;;  %p754_p9 = scmp.lt.u32.totalorder %s750_s13, %s984_s0 }
  0x19   :  { %p756_p10 = pnand %p754_p9, %p751_p8 }
  0x1b   :  { %759 = shalt.err (!%p756_p10)
}
  0x1c   :  { %s760_s1 = scalar_lea.vmem %s21_s8, 64  ;;  %p765_p12 = scmp.lt.s32.totalorder %s21_s8, %s21_s8 }
  0x1d   :  { %p761_p11 = scmp.ne.s32.totalorder %s21_s8, %s760_s1  ;;  %p766_p13 = scmp.lt.s32.totalorder %s760_s1, %s760_s1 }
  0x1f   :  { %p767_p0 = por %p766_p13, %p765_p12 }
  0x21   :  { %p768_p1 = pnand %p767_p0, %p761_p11 }
  0x23   :  { %771 = shalt.err (!%p768_p1)
}
  0x24   :  { %23 = dma.hbm_to_vmem [thread:$0]  %s984_s0, 64, %s21_s8, [#allocation3]  }
  0x25   :  { %s772_s22 = scalar_lea.hbm %s986_s2, 2048 }
  0x26   :  { %p773_p2 = scmp.ne.s32.totalorder %s986_s2, %s772_s22  ;;  %p776_p3 = scmp.lt.u32.totalorder %s772_s22, %s986_s2 }
  0x28   :  { %p778_p4 = pnand %p776_p3, %p773_p2 }
  0x2a   :  { %781 = shalt.err (!%p778_p4)
}
  0x2b   :  { %s782_s27 = scalar_lea.vmem %s42_s10, 2048  ;;  %p787_p6 = scmp.lt.s32.totalorder %s42_s10, %s42_s10 }
  0x2c   :  { %p783_p5 = scmp.ne.s32.totalorder %s42_s10, %s782_s27  ;;  %p788_p7 = scmp.lt.s32.totalorder %s782_s27, %s782_s27 }
  0x2e   :  { %p789_p8 = por %p788_p7, %p787_p6 }
  0x30   :  { %p790_p9 = pnand %p789_p8, %p783_p5 }
  0x32   :  { %793 = shalt.err (!%p790_p9)
}
  0x33   :  { %s851_s0 = smov 64   ;;  %s852_s30 = smov 4  }
  0x34   :  { %47 = dma.hbm_to_vmem [thread:$0]  %s986_s2, 2048, %s42_s10, [#allocation6], %s851_s0, %s851_s0, %s852_s30  }
  0x35   :  { %s853_s8 = smov [#allocation8]   ;;  %s794_s13 = scalar_lea.hbm %s987_s3, 2048 }
  0x36   :  { %s53_s9 = sshll.u32 %s853_s8, 4  ;;  %p795_p10 = scmp.ne.s32.totalorder %s987_s3, %s794_s13  ;;  %s54_s9 = int_to_ptr.vmem [resolvable:$true] %s53_s9 }
  0x37   :  { %p798_p11 = scmp.lt.u32.totalorder %s794_s13, %s987_s3 }
  0x39   :  { %p800_p12 = pnand %p798_p11, %p795_p10 }
  0x3b   :  { %803 = shalt.err (!%p800_p12)
}
  0x3c   :  { %s804_s1 = scalar_lea.vmem %s54_s9, 2048  ;;  %p809_p0 = scmp.lt.s32.totalorder %s54_s9, %s54_s9 }
  0x3d   :  { %p805_p13 = scmp.ne.s32.totalorder %s54_s9, %s804_s1  ;;  %p810_p1 = scmp.lt.s32.totalorder %s804_s1, %s804_s1 }
  0x3f   :  { %p811_p2 = por %p810_p1, %p809_p0 }
  0x41   :  { %p812_p3 = pnand %p811_p2, %p805_p13 }
  0x43   :  { %815 = shalt.err (!%p812_p3)
}
  0x44   :  { %59 = dma.hbm_to_vmem [thread:$0]  %s987_s3, 2048, %s54_s9, [#allocation9], %s847_s28, %s847_s28, %s848_s29  }
  0x45   :  { %838 = dma.done.wait [#allocation3], 64  }
  0x46   :  { %839 = vsyncadd [#allocation3], 4294967232 }
  0x47   :  { %840 = dma.done.wait [#allocation6], 2304  }
  0x48   :  { %841 = vsyncadd [#allocation6], 4294964992 }
  0x49   :  { %842 = dma.done.wait [#allocation9], 2048  }
  0x4a   :  { %843 = vsyncadd [#allocation9], 4294965248  ;;  %v854_v0 = vmov 0   ;;  %v693_v1 = vld [vmem:[#allocation5 + $0x4] ss:$8 sps:$4 sm:$0xff]   ;;  %v696_v4 = vld [vmem:[#allocation7 + $0x40] sm:$0xff]   ;;  %v83_v27 = vlaneseq }
  0x4b   :  { %139 = vmatprep.mubr.bf16.mxu0 %v854_v0  ;;  %v695_v2 = vld [vmem:[#allocation5] ss:$8 sps:$4 sm:$0xff]   ;;  %v75_v3 = vld [vmem:[#allocation2] sm:$0xf]  ;;  %107 = vmatprep.subr.bf16.mxu0 %v693_v1  ;;  %vm103_vm0 = vcmask 130048   ;;  %v697_v5 = vld [vmem:[#allocation7] sm:$0xff]  }
  0x4c   :  { %108 = vmatpush1.bf16.msra.mxu0 %v695_v2  ;;  %601 = vmatprep.subr.bf16.mxu1 %v696_v4  ;;  %v698_v6 = vld [vmem:[#allocation7 + $0x48] sm:$0xff]   ;;  %v700_v8 = vld [vmem:[#allocation7 + $0x50] sm:$0xff]   ;;  %v702_v10 = vld [vmem:[#allocation7 + $0x58] sm:$0xff]   ;;  %v855_v21 = vmov 0.0   ;;  %v84_v28 = vshrl.u32 %v83_v27, 7  ;;  %vm856_vm1 = vmmov 0  }
  0x4d   :  { %602 = vmatpush3.bf16.msra.mxu1 %v697_v5  ;;  %v699_v7 = vld [vmem:[#allocation7 + $0x8] sm:$0xff]   ;;  %v701_v9 = vld [vmem:[#allocation7 + $0x10] sm:$0xff]   ;;  %v703_v11 = vld [vmem:[#allocation7 + $0x18] sm:$0xff]   ;;  %641 = vmatprep.subr.bf16.mxu0 %v855_v21  ;;  %s857_s23 = smov [#allocation10]   ;;  %vm544_vm2 = vcmask 64512  }
  0x4e   :  { %603 = vmatprep.subr.bf16.mxu1 %v698_v6  ;;  %v704_v12 = vld [vmem:[#allocation7 + $0x60] sm:$0xff]   ;;  %v706_v14 = vld [vmem:[#allocation7 + $0x68] sm:$0xff]   ;;  %v708_v16 = vld [vmem:[#allocation7 + $0x70] sm:$0xff]   ;;  %v85_v29 = vsub.s32 0, %v84_v28  ;;  %v89_v31 = vsub.s32 1, %v84_v28  ;;  %s552_s24 = sshll.u32 %s857_s23, 4  ;;  %s553_s24 = int_to_ptr.vmem [resolvable:$true] %s552_s24 }
  0x4f   :  { %565 = vmatmul.mubr.msk.bf16.vlgmr.msra.gmra.mrb[0].mxu0 %vm103_vm0, %v75_v3  ;;  %v705_v13 = vld [vmem:[#allocation7 + $0x20] sm:$0xff]   ;;  %v707_v15 = vld [vmem:[#allocation7 + $0x28] sm:$0xff]   ;;  %v709_v17 = vld [vmem:[#allocation7 + $0x30] sm:$0xff]   ;;  %s816_s25 = scalar_lea.vmem %s553_s24, 128  ;;  %p821_p5 = scmp.lt.s32.totalorder %s553_s24, %s553_s24 }
  0x50   :  { %v710_v18 = vld [vmem:[#allocation7 + $0x78] sm:$0xff]   ;;  %v712_v20 = vld [vmem:[#allocation8] ss:$8 sps:$4 sm:$0xff]   ;;  %657 = vmatprep.mubr.msk.bf16.mxu0 %vm856_vm1, %v855_v21  ;;  %v720_v46 = vld [vmem:[#allocation8 + $0x4] ss:$8 sps:$4 sm:$0xff]   ;;  %p817_p4 = scmp.ne.s32.totalorder %s553_s24, %s816_s25  ;;  %p822_p6 = scmp.lt.s32.totalorder %s816_s25, %s816_s25 }
  0x51   :  { %604 = vmatpush3.bf16.msra.mxu1 %v699_v7  ;;  %v711_v19 = vld [vmem:[#allocation7 + $0x38] sm:$0xff]   ;;  %642 = vmatpush3.bf16.msra.mxu0 %v712_v20  ;;  %v714_v23 = vld [vmem:[#allocation8 + $0x20] ss:$8 sps:$4 sm:$0xff]   ;;  %v722_v48 = vld [vmem:[#allocation8 + $0x24] ss:$8 sps:$4 sm:$0xff]  }
  0x52   :  { %605 = vmatprep.subr.bf16.mxu1 %v700_v8  ;;  %v713_v22 = vld [vmem:[#allocation8 + $0x10] ss:$8 sps:$4 sm:$0xff]   ;;  %643 = vmatprep.subr.bf16.mxu0 %v855_v21  ;;  %v716_v25 = vld [vmem:[#allocation8 + $0x40] ss:$8 sps:$4 sm:$0xff]   ;;  %v721_v47 = vld [vmem:[#allocation8 + $0x14] ss:$8 sps:$4 sm:$0xff]   ;;  %p823_p7 = por %p822_p6, %p821_p5 }
  0x53   :  { %v715_v24 = vld [vmem:[#allocation8 + $0x30] ss:$8 sps:$4 sm:$0xff]   ;;  %v76_v30 = vld [vmem:[%s988_s4] ss:$4 sm:$0x3] }
  0x54   :  { %v717_v26 = vld [vmem:[#allocation8 + $0x50] ss:$8 sps:$4 sm:$0xff]   ;;  %v86_v32 = vrot.slane %v76_v30, %v85_v29  ;;  %v90_v33 = vrot.slane %v76_v30, %v89_v31  ;;  %v718_v44 = vld [vmem:[#allocation8 + $0x60] ss:$8 sps:$4 sm:$0xff]   ;;  %v723_v49 = vld [vmem:[#allocation8 + $0x34] ss:$8 sps:$4 sm:$0xff]   ;;  %p824_p8 = pnand %p823_p7, %p817_p4 }
  0x55   :  { %606 = vmatpush3.bf16.msra.mxu1 %v701_v9  ;;  %644 = vmatpush3.bf16.msra.mxu0 %v713_v22  ;;  %v719_v45 = vld [vmem:[#allocation8 + $0x70] ss:$8 sps:$4 sm:$0xff]   ;;  %v724_v50 = vld [vmem:[#allocation8 + $0x44] ss:$8 sps:$4 sm:$0xff]   ;;  %v725_v51 = vld [vmem:[#allocation8 + $0x54] ss:$8 sps:$4 sm:$0xff]  }
  0x56   :  { %607 = vmatprep.subr.bf16.mxu1 %v702_v10  ;;  %645 = vmatprep.subr.bf16.mxu0 %v855_v21  ;;  %v566_v53 = vld [vmem:[%s988_s4 + $0x1] ss:$0 sm:$0xff]  ;;  %v727_v62 = vld [vmem:[#allocation8 + $0x74] ss:$8 sps:$4 sm:$0xff]   ;;  %v583_v63 = vld [vmem:[%s988_s4 + $0x2] ss:$0 sm:$0xff] }
  0x57   :  { %v726_v61 = vld [vmem:[#allocation8 + $0x64] ss:$8 sps:$4 sm:$0xff]  }
  0x58   :  { %v592_v7 = vld [vmem:[%s988_s4 + $0x3] ss:$0 sm:$0xff] }
  0x59   :  { %608 = vmatpush3.bf16.msra.mxu1 %v703_v11  ;;  %646 = vmatpush3.bf16.msra.mxu0 %v714_v23 }
  0x5a   :  { %609 = vmatprep.subr.bf16.mxu1 %v704_v12  ;;  %647 = vmatprep.subr.bf16.mxu0 %v855_v21 }
  0x5d   :  { %610 = vmatpush3.bf16.msra.mxu1 %v705_v13  ;;  %648 = vmatpush3.bf16.msra.mxu0 %v715_v24 }
  0x5e   :  { %611 = vmatprep.subr.bf16.mxu1 %v706_v14  ;;  %649 = vmatprep.subr.bf16.mxu0 %v855_v21 }
  0x61   :  { %612 = vmatpush3.bf16.msra.mxu1 %v707_v15  ;;  %650 = vmatpush3.bf16.msra.mxu0 %v716_v25 }
  0x62   :  { %613 = vmatprep.subr.bf16.mxu1 %v708_v16  ;;  %651 = vmatprep.subr.bf16.mxu0 %v855_v21 }
  0x65   :  { %614 = vmatpush3.bf16.msra.mxu1 %v709_v17  ;;  %652 = vmatpush3.bf16.msra.mxu0 %v717_v26 }
  0x66   :  { %615 = vmatprep.subr.bf16.mxu1 %v710_v18  ;;  %653 = vmatprep.subr.bf16.mxu0 %v855_v21 }
  0x69   :  { %616 = vmatpush3.bf16.msra.mxu1 %v711_v19  ;;  %654 = vmatpush3.bf16.msra.mxu0 %v718_v44 }
  0x6a   :  { %661 = vmatprep.subr.bf16.mxu1 %v855_v21  ;;  %655 = vmatprep.subr.bf16.mxu0 %v855_v21 }
  0x6d   :  { %656 = vmatpush3.bf16.msra.mxu0 %v719_v45 }
 0x122   :  { %v141_v34 = vpop.f32.mrb[0].mxu0 }
 0x123   :  { %v142_v35 = vadd.f32 %v141_v34, %v86_v32  ;;  %v143_v36 = vpop.f32.mrb[1].mxu0 }
 0x124   :  { %v144_v37 = vadd.f32 %v143_v36, %v90_v33  ;;  %v145_v38 = vpop.f32.mrb[2].mxu0 }
 0x125   :  { %v148_v39 = vmax.f32 %v142_v35, 0.0  ;;  %v146_v40 = vpop.f32.mrb[3].mxu0 }
 0x126   :  { %v149_v41 = vmax.f32 %v144_v37, 0.0 }
 0x127   :  { %v150_v43 = vpack.c.bf16 %v148_v39, %v148_v39 }
 0x128   :  { %v151_v42 = vpack.c.bf16 %v149_v41, %v149_v41 }
 0x12a   :  { %316 = vmatprep.mubr.bf16.mxu1 %v151_v42 }
 0x12b   :  { %317 = vmatmul.mubr.bf16.vlgmr.msra.gmra.mrb[0].mxu1 %v150_v43 }
 0x12c   :  { %677 = vmatprep.mubr.msk.bf16.mxu1 %vm856_vm1, %v855_v21  ;;  %662 = vmatpush3.bf16.msra.mxu1 %v720_v46 }
 0x12d   :  { %663 = vmatprep.subr.bf16.mxu1 %v855_v21 }
 0x130   :  { %664 = vmatpush3.bf16.msra.mxu1 %v721_v47 }
 0x131   :  { %665 = vmatprep.subr.bf16.mxu1 %v855_v21 }
 0x134   :  { %666 = vmatpush3.bf16.msra.mxu1 %v722_v48 }
 0x135   :  { %667 = vmatprep.subr.bf16.mxu1 %v855_v21 }
 0x138   :  { %668 = vmatpush3.bf16.msra.mxu1 %v723_v49 }
 0x139   :  { %669 = vmatprep.subr.bf16.mxu1 %v855_v21 }
 0x13c   :  { %670 = vmatpush3.bf16.msra.mxu1 %v724_v50 }
 0x13d   :  { %671 = vmatprep.subr.bf16.mxu1 %v855_v21 }
 0x140   :  { %672 = vmatpush3.bf16.msra.mxu1 %v725_v51 }
 0x141   :  { %673 = vmatprep.subr.bf16.mxu1 %v855_v21 }
 0x144   :  { %674 = vmatpush3.bf16.msra.mxu1 %v726_v61 }
 0x145   :  { %675 = vmatprep.subr.bf16.mxu1 %v855_v21 }
 0x148   :  { %676 = vmatpush3.bf16.msra.mxu1 %v727_v62 }
 0x1fe   :  { %v617_v52 = vpop.f32.mrb[0].mxu1 }
 0x1ff   :  { %v618_v54 = vpop.f32.mrb[1].mxu1 }
 0x200   :  { %v619_v55 = vadd.f32 %v618_v54, %v617_v52  ;;  %v620_v56 = vpop.f32.mrb[2].mxu1 }
 0x201   :  { %v621_v57 = vpop.f32.mrb[3].mxu1 }
 0x202   :  { %v319_v58 = vadd.f32 %v619_v55, %v566_v53 }
 0x204   :  { %v324_v59 = vmax.f32 %v319_v58, 0.0 }
 0x206   :  { %v325_v60 = vpack.c.bf16 %v324_v59, %v324_v59 }
 0x208   :  { %658 = vmatmul.mubr.bf16.vlgmr.msra.gmra.mrb[4].mxu0 %v325_v60 }
 0x2db   :  { %v428_v0 = vpop.f32.mrb[4].mxu0 }
 0x2dc   :  { %v429_v1 = vadd.f32 %v583_v63, %v428_v0  ;;  %v659_v2 = vpop.f32.mrb[5].mxu0 }
 0x2dd   :  { %v431_v3 = vpop.f32.mrb[6].mxu0 }
 0x2de   :  { %v434_v4 = vmax.f32 %v429_v1, 0.0  ;;  %v660_v5 = vpop.f32.mrb[7].mxu0 }
 0x2e0   :  { %v435_v6 = vpack.c.bf16 %v434_v4, %v434_v4 }
 0x2e2   :  { %678 = vmatmul.mubr.bf16.vlgmr.msra.gmra.mrb[4].mxu1 %v435_v6 }
 0x3b5   :  { %v538_v8 = vpop.f32.mrb[4].mxu1 }
 0x3b6   :  { %v539_v9 = vadd.f32 %v592_v7, %v538_v8  ;;  %v679_v10 = vpop.f32.mrb[5].mxu1 }
 0x3b7   :  { %v541_v11 = vpop.f32.mrb[6].mxu1 }
 0x3b8   :  { %v680_v12 = vpop.f32.mrb[7].mxu1  ;;  %545 = vst.msk [vmem:[#allocation10] sm:$0xff] %vm544_vm2, %v539_v9 }
 0x3b9   :  { %827 = shalt.err (!%p824_p8)
}
 0x3ba   :  { %s828_s4 = scalar_lea.hbm %s989_s5, 128 }
 0x3bb   :  { %p829_p9 = scmp.ne.s32.totalorder %s989_s5, %s828_s4  ;;  %p832_p10 = scmp.lt.u32.totalorder %s828_s4, %s989_s5 }
 0x3bd   :  { %p834_p11 = pnand %p832_p10, %p829_p9 }
 0x3bf   :  { %837 = shalt.err (!%p834_p11)
}
 0x3c0   :  { %555 = dma.vmem_to_hbm [thread:$0]  %s553_s24, 128, %s989_s5, [#allocation4]  }
 0x3c1   :  { %844 = dma.done.wait [#allocation4], 128  }
 0x3c2   :  { %845 = vsyncadd [#allocation4], 4294967168 }
 0x3c3   :  { %559 = vsyncpa [#allocation3], 1 }
 0x3c4   :  { %560 = vsyncpa [#allocation6], 1 }
 0x3c5   :  { %561 = vsyncpa [#allocation9], 1 }
 0x3c6   :  { %562 = vsyncpa [#allocation4], 1 }

</bundles_post_ra>
